<compile_context>
chip_gen: v5e
topology: v5e:2x2
jax: 0.10.0
libtpu: 0.0.40
codegen_flags: <defaults>
</compile_context>

<pallas_src>
import numpy as np
import jax
import jax.numpy as jnp
from jax.experimental import pallas as pl
from jax.experimental.pallas import tpu as pltpu

# ---------------- configuration (small shapes consistent with the module) ----------------
BATCH = 2
C_IN = 64                      # in_channels
C_OUT = 32                     # out_channels == hidden_size of the transformer blocks
S_IN = 4                       # input spatial size
UPK = 2                        # upsample_kernel_size == stride of the transposed conv
S_OUT = S_IN * UPK             # 8
N_TOK = S_OUT ** 3             # 512 == out_size / EPA input_size
NUM_HEADS = 4
HEAD_DIM = C_OUT // NUM_HEADS  # 8
PROJ_SIZE = 64                 # EPA proj_size (shared E = F projection)
DEPTH = 3                      # default decoder depth
LN_EPS = 1e-5
BN_EPS = 1e-5
LRELU_SLOPE = 0.01


# ======================= Pallas kernel 1: ConvTranspose3d(k=s=2) + skip =======================
def deconv_skip_kernel(xf_ref, w_ref, skip_ref, o_ref):
    # (B*S^3, Cin) @ (Cin, 8*Cout) + skip  ->  lane-dense 256-wide output
    o_ref[...] = (jnp.dot(xf_ref[...], w_ref[...], preferred_element_type=jnp.float32)
                  + skip_ref[...]).astype(o_ref.dtype)


@jax.jit
def run_upsample_skip(inp, skip, wt):
    B = inp.shape[0]
    f32, bf16 = jnp.float32, jnp.bfloat16
    M = B * S_IN ** 3
    KCOL = UPK ** 3 * C_OUT                                   # 256 lanes (2 x 128)

    xf = inp.transpose(0, 2, 3, 4, 1).reshape(M, C_IN).astype(bf16)
    # ConvTranspose3d weight (Cin, Cout, 2,2,2) -> (Cin, (d,e,f,Cout)) flat matmul form
    wflat = wt.transpose(0, 2, 3, 4, 1).reshape(C_IN, KCOL).astype(bf16)
    # skip rearranged so the add can be fused: row=(b,i,j,k), col=((d,e,f),o)
    skip_cl = skip.transpose(0, 2, 3, 4, 1)
    skip_re = skip_cl.reshape(B, S_IN, UPK, S_IN, UPK, S_IN, UPK, C_OUT)
    skip_re = skip_re.transpose(0, 1, 3, 5, 2, 4, 6, 7).reshape(M, KCOL).astype(f32)

    def const(shape):
        nd = len(shape)
        return pl.BlockSpec(shape, lambda *_: (0,) * nd)

    up = pl.pallas_call(
        deconv_skip_kernel,
        out_shape=jax.ShapeDtypeStruct((M, KCOL), jnp.float32),
        grid=(1,),
        in_specs=[const((M, C_IN)), const((C_IN, KCOL)), const((M, KCOL))],
        out_specs=const((M, KCOL)),
        compiler_params=pltpu.CompilerParams(dimension_semantics=("arbitrary",)),
    )(xf, wflat, skip_re)

    # un-interleave back to channel-last volume, then tokens (B, N, C)
    up = up.reshape(B, S_IN, S_IN, S_IN, UPK, UPK, UPK, C_OUT)
    up = up.transpose(0, 1, 4, 2, 5, 3, 6, 7).reshape(B, S_OUT, S_OUT, S_OUT, C_OUT)
    return up.reshape(B, N_TOK, C_OUT)


# ======================= Pallas kernel 2: one fused EPA TransformerBlock =======================
def transformer_block_kernel(x_ref, pe_ref, lng_ref, lnb_ref, wq4_ref,
                             wef_ref, befr_ref, befc_ref, trow_ref, t2col_ref,
                             wsa_ref, wca_ref, bout_ref, gamma_ref,
                             w1_ref, s1_ref, h1_ref, w2_ref, s2_ref, h2_ref,
                             w8_ref, b8_ref, o_ref):
    f32, bf16 = jnp.float32, jnp.bfloat16
    N, C = pe_ref.shape
    NH, HD, P = NUM_HEADS, HEAD_DIM, PROJ_SIZE
    SP = S_OUT

    # residual stream in token order (N, C); per-block pos_embed
    x = x_ref[0] + pe_ref[...]

    # ---- LayerNorm (f32, VPU) ----
    mu = jnp.mean(x, axis=-1, keepdims=True)
    xc = x - mu
    var = jnp.mean(xc * xc, axis=-1, keepdims=True)
    xn = xc * jax.lax.rsqrt(var + LN_EPS) * lng_ref[...] + lnb_ref[...]

    # ---- EPA shared q/k/v_CA/v_SA projection: single lane-dense (N,32)@(32,128) matmul ----
    qkvv = jnp.dot(xn.astype(bf16), wq4_ref[...], preferred_element_type=f32)
    q = qkvv[:, 0 * C:1 * C]
    k = qkvv[:, 1 * C:2 * C]
    v_ca = qkvv[:, 2 * C:3 * C]
    v_sa = qkvv[:, 3 * C:4 * C]

    # L2-normalize q / k along the token axis (per (head, head_dim) channel)
    qn = q * (1.0 / jnp.maximum(jnp.sqrt(jnp.sum(q * q, axis=0, keepdims=True)), 1e-12))
    kn = k * (1.0 / jnp.maximum(jnp.sqrt(jnp.sum(k * k, axis=0, keepdims=True)), 1e-12))

    # ---- channel attention: full (C,C) gram + block-diagonal head mask (no head slicing) ----
    gram = jnp.einsum("nc,nd->cd", qn.astype(bf16), kn.astype(bf16),
                      preferred_element_type=f32)                      # (C, C)
    rh = jax.lax.broadcasted_iota(jnp.int32, (C, C), 0) // HD
    ch = jax.lax.broadcasted_iota(jnp.int32, (C, C), 1) // HD
    logits_ca = gram * trow_ref[...] + jnp.where(rh == ch, 0.0, -1e30)
    logits_ca = logits_ca - jnp.max(logits_ca, axis=-1, keepdims=True)
    e_ca = jnp.exp(logits_ca)
    a_ca = e_ca * pl.reciprocal(jnp.sum(e_ca, axis=-1, keepdims=True), approx=True)
    # heads fused into one K=32 matmul:  x_CA[n,c] = sum_c' a_ca[c,c'] * v_ca[n,c']
    x_ca = jnp.einsum("np,cp->nc", v_ca.astype(bf16), a_ca.astype(bf16),
                      preferred_element_type=f32)                      # (N, C)

    # ---- spatial attention: heads packed into lanes via block-diagonal K / V^T ----
    # project (unnormalized) k and v_SA from N=512 tokens to P=64 (shared E = F weights)
    kp = jnp.einsum("nc,np->cp", k.astype(bf16), wef_ref[...],
                    preferred_element_type=f32) + befr_ref[...]        # (C, P)
    vpT = jnp.einsum("np,nc->pc", wef_ref[...], v_sa.astype(bf16),
                     preferred_element_type=f32) + befc_ref[...]       # (P, C)
    colh = jax.lax.broadcasted_iota(jnp.int32, (C, NH * P), 1) // P
    rowh = jax.lax.broadcasted_iota(jnp.int32, (C, NH * P), 0) // HD
    kbd = jnp.where(colh == rowh, jnp.concatenate([kp] * NH, axis=1), 0.0)   # (32, 256)
    logits_sa = jnp.dot(qn.astype(bf16), kbd.astype(bf16),
                        preferred_element_type=f32) * t2col_ref[...]   # (N, 256) lane-dense
    # per-row max is constant inside every head group -> per-head softmax unchanged
    logits_sa = logits_sa - jnp.max(logits_sa, axis=-1, keepdims=True)
    e_sa = jnp.exp(logits_sa)
    # segmented (per head group of P columns) denominator via block-ones matmul (no reshapes)
    rg = jax.lax.broadcasted_iota(jnp.int32, (NH * P, NH * P), 0) // P
    cg = jax.lax.broadcasted_iota(jnp.int32, (NH * P, NH * P), 1) // P
    blk_ones = jnp.where(rg == cg, 1.0, 0.0)
    denom = jnp.dot(e_sa, blk_ones, preferred_element_type=f32)
    a_sa = e_sa * pl.reciprocal(denom, approx=True)                    # (N, 256)
    vrh = jax.lax.broadcasted_iota(jnp.int32, (NH * P, C), 0) // P
    vch = jax.lax.broadcasted_iota(jnp.int32, (NH * P, C), 1) // HD
    vbd = jnp.where(vrh == vch, jnp.concatenate([vpT] * NH, axis=0), 0.0)    # (256, 32)
    x_sa = jnp.dot(a_sa.astype(bf16), vbd.astype(bf16), preferred_element_type=f32)  # (N, C)

    # ---- fused out_proj / out_proj2 + concat (zero-padded (C,C) weights, no lane concat) ----
    epa = (jnp.dot(x_sa.astype(bf16), wsa_ref[...], preferred_element_type=f32)
           + jnp.dot(x_ca.astype(bf16), wca_ref[...], preferred_element_type=f32)
           + bout_ref[...])

    attn_tok = x + gamma_ref[...] * epa                                 # (N, C)

    # ---- conv51 (UnetResBlock, eval-folded BatchNorm) + conv8 (1x1) + residuals ----
    def conv3x3x3(tok, wref):
        vol = tok.reshape(SP, SP, SP, C)
        zi = jnp.zeros((1, SP, SP, C), f32)
        pvol = jnp.concatenate([zi, vol, zi], axis=0)
        zj = jnp.zeros((SP + 2, 1, SP, C), f32)
        pvol = jnp.concatenate([zj, pvol, zj], axis=1)
        zk = jnp.zeros((SP + 2, SP + 2, 1, C), f32)
        pvol = jnp.concatenate([zk, pvol, zk], axis=2)                  # (10,10,10,C)
        acc = jnp.zeros((N, C), f32)
        for dk in range(3):
            slab = pvol[:, :, dk:dk + SP, :]                            # (10,10,8,C)
            for di in range(3):
                for dj in range(3):
                    win = slab[di:di + SP, dj:dj + SP]                  # (8,8,8,C)
                    acc = acc + jnp.dot(win.reshape(N, C).astype(bf16),
                                        wref[(di * 3 + dj) * 3 + dk],
                                        preferred_element_type=f32)
        return acc

    h = conv3x3x3(attn_tok, w1_ref) * s1_ref[...] + h1_ref[...]
    h = jnp.where(h > 0, h, LRELU_SLOPE * h)
    h = conv3x3x3(h, w2_ref) * s2_ref[...] + h2_ref[...]
    h = h + attn_tok                                                    # UnetResBlock residual
    h = jnp.where(h > 0, h, LRELU_SLOPE * h)
    out8 = jnp.dot(h.astype(bf16), w8_ref[...], preferred_element_type=f32) + b8_ref[...]

    o_ref[0] = (attn_tok + out8).astype(o_ref.dtype)


def _fold_bn(bn):
    # eval-mode BatchNorm3d folded to per-channel scale/shift
    scale = bn["w"] / jnp.sqrt(bn["var"] + BN_EPS)
    shift = bn["b"] - bn["mean"] * scale
    return scale[None, :].astype(jnp.float32), shift[None, :].astype(jnp.float32)


@jax.jit
def run_transformer_block(x_tok, p):
    B, N, C = x_tok.shape
    f32, bf16 = jnp.float32, jnp.bfloat16

    wq4 = p["w_qkvv"].T.astype(bf16)                                    # (C, 4C)
    wef = p["w_ef"].T.astype(bf16)                                      # (N, P)
    befr = p["b_ef"][None, :].astype(f32)
    befc = p["b_ef"][:, None].astype(f32)
    trow = jnp.repeat(p["temperature"], HEAD_DIM)[:, None].astype(f32)      # (C, 1)
    t2col = jnp.repeat(p["temperature2"], PROJ_SIZE)[None, :].astype(f32)   # (1, NH*P)
    zero_half = jnp.zeros((C, C // 2), f32)
    wsa = jnp.concatenate([p["w_op"].T, zero_half], axis=1).astype(bf16)     # (C, C)
    wca = jnp.concatenate([zero_half, p["w_op2"].T], axis=1).astype(bf16)    # (C, C)
    bout = jnp.concatenate([p["b_op"], p["b_op2"]])[None, :].astype(f32)
    gamma = p["gamma"][None, :].astype(f32)
    pe = p["pos_embed"][0].astype(f32)
    lng = p["ln_g"][None, :].astype(f32)
    lnb = p["ln_b"][None, :].astype(f32)
    s1, h1 = _fold_bn(p["bn1"])
    s2, h2 = _fold_bn(p["bn2"])
    w1 = p["w_c1"].reshape(27, C, C).astype(bf16)
    w2 = p["w_c2"].reshape(27, C, C).astype(bf16)
    w8 = p["w_c8"].T.astype(bf16)
    b8 = p["b_c8"][None, :].astype(f32)

    def const(shape):
        nd = len(shape)
        return pl.BlockSpec(shape, lambda *_: (0,) * nd)

    io_spec = pl.BlockSpec((1, N, C), lambda b: (b, 0, 0))

    return pl.pallas_call(
        transformer_block_kernel,
        out_shape=jax.ShapeDtypeStruct((B, N, C), jnp.float32),
        grid=(B,),
        in_specs=[
            io_spec,                                         # x tokens
            const((N, C)),                                   # pos_embed
            const((1, C)), const((1, C)),                    # LayerNorm g, b
            const((C, 4 * C)),                               # qkvv weight (transposed)
            const((N, PROJ_SIZE)),                           # shared E = F weight (transposed)
            const((1, PROJ_SIZE)), const((PROJ_SIZE, 1)),    # E/F bias (row / col)
            const((C, 1)),                                   # temperature  (per channel row)
            const((1, NUM_HEADS * PROJ_SIZE)),               # temperature2 (per packed col)
            const((C, C)), const((C, C)),                    # zero-padded out_proj / out_proj2
            const((1, C)),                                   # fused out-proj bias
            const((1, C)),                                   # gamma
            const((27, C, C)),                               # conv1 weights
            const((1, C)), const((1, C)),                    # bn1 scale / shift
            const((27, C, C)),                               # conv2 weights
            const((1, C)), const((1, C)),                    # bn2 scale / shift
            const((C, C)), const((1, C)),                    # conv8 (1x1) weight / bias
        ],
        out_specs=io_spec,
        compiler_params=pltpu.CompilerParams(dimension_semantics=("parallel",)),
    )(x_tok, pe, lng, lnb, wq4, wef, befr, befc, trow, t2col,
      wsa, wca, bout, gamma, w1, s1, h1, w2, s2, h2, w8, b8)


# ======================= full UnetrUpBlock1 forward (eval mode) =======================
def unetr_up_block1_forward(inp, skip, params):
    B = inp.shape[0]
    x_tok = run_upsample_skip(inp, skip, params["wt"])          # transp_conv(inp) + skip -> tokens
    for bp in params["blocks"]:                                 # depth x TransformerBlock
        x_tok = run_transformer_block(x_tok, bp)
    return x_tok.reshape(B, S_OUT, S_OUT, S_OUT, C_OUT).transpose(0, 4, 1, 2, 3)


# ======================= deterministic parameter init =======================
def init_params(key):
    keys = jax.random.split(key, 100)
    it = iter(keys)
    std = 0.02

    def nrm(shape, s=std):
        return s * jax.random.normal(next(it), shape, jnp.float32)

    params = {"wt": nrm((C_IN, C_OUT, UPK, UPK, UPK))}   # ConvTranspose3d weight, bias=False
    blocks = []
    for _ in range(DEPTH):
        blk = {
            "pos_embed": nrm((1, N_TOK, C_OUT)),
            "ln_g": 1.0 + nrm((C_OUT,), 0.1),
            "ln_b": nrm((C_OUT,)),
            "w_qkvv": nrm((4 * C_OUT, C_OUT)),           # nn.Linear(C, 4C, bias=False)
            "w_ef": nrm((PROJ_SIZE, N_TOK)),             # shared E = F: nn.Linear(N, P)
            "b_ef": nrm((PROJ_SIZE,)),
            "temperature": 1.0 + nrm((NUM_HEADS,), 0.1),
            "temperature2": 1.0 + nrm((NUM_HEADS,), 0.1),
            "w_op": nrm((C_OUT // 2, C_OUT)),            # out_proj  (spatial branch)
            "b_op": nrm((C_OUT // 2,)),
            "w_op2": nrm((C_OUT // 2, C_OUT)),           # out_proj2 (channel branch)
            "b_op2": nrm((C_OUT // 2,)),
            "gamma": nrm((C_OUT,), 0.1),                 # torch init 1e-6; randomized to exercise path
            "w_c1": nrm((3, 3, 3, C_OUT, C_OUT)),        # conv weights stored DHWIO
            "bn1": {"w": 1.0 + nrm((C_OUT,), 0.1), "b": nrm((C_OUT,)),
                    "mean": nrm((C_OUT,), 0.1),
                    "var": 1.0 + 0.1 * jnp.abs(jax.random.normal(next(it), (C_OUT,), jnp.float32))},
            "w_c2": nrm((3, 3, 3, C_OUT, C_OUT)),
            "bn2": {"w": 1.0 + nrm((C_OUT,), 0.1), "b": nrm((C_OUT,)),
                    "mean": nrm((C_OUT,), 0.1),
                    "var": 1.0 + 0.1 * jnp.abs(jax.random.normal(next(it), (C_OUT,), jnp.float32))},
            "w_c8": nrm((C_OUT, C_OUT)),                 # Conv3d(C, C, 1) weight (out, in)
            "b_c8": nrm((C_OUT,)),
        }
        blocks.append(blk)
    params["blocks"] = blocks
    return params


# ======================= pure-JAX f32 reference (mirrors the PyTorch forward) =======================
def _reference_transformer_block(xvol, p):
    B, C, Hs, Ws, Ds = xvol.shape
    N = Hs * Ws * Ds
    x = xvol.reshape(B, C, N).transpose(0, 2, 1) + p["pos_embed"]
    mu = x.mean(-1, keepdims=True)
    var = ((x - mu) ** 2).mean(-1, keepdims=True)
    xn = (x - mu) / jnp.sqrt(var + LN_EPS) * p["ln_g"] + p["ln_b"]

    qkvv = jnp.einsum("bnc,dc->bnd", xn, p["w_qkvv"])
    qkvv = qkvv.reshape(B, N, 4, NUM_HEADS, HEAD_DIM).transpose(2, 0, 3, 1, 4)
    q, k, v_ca, v_sa = qkvv[0], qkvv[1], qkvv[2], qkvv[3]              # (B,H,N,d)
    q, k = jnp.swapaxes(q, -2, -1), jnp.swapaxes(k, -2, -1)            # (B,H,d,N)
    v_ca, v_sa = jnp.swapaxes(v_ca, -2, -1), jnp.swapaxes(v_sa, -2, -1)

    k_proj = jnp.einsum("bhdn,pn->bhdp", k, p["w_ef"]) + p["b_ef"]     # (B,H,d,P)
    v_proj = jnp.einsum("bhdn,pn->bhdp", v_sa, p["w_ef"]) + p["b_ef"]

    qn = q / jnp.maximum(jnp.linalg.norm(q, axis=-1, keepdims=True), 1e-12)
    kn = k / jnp.maximum(jnp.linalg.norm(k, axis=-1, keepdims=True), 1e-12)

    attn_ca = jnp.einsum("bhdn,bhen->bhde", qn, kn) * p["temperature"][None, :, None, None]
    attn_ca = jax.nn.softmax(attn_ca, axis=-1)
    x_ca = jnp.einsum("bhde,bhen->bhdn", attn_ca, v_ca)
    x_ca = x_ca.transpose(0, 3, 1, 2).reshape(B, N, C)

    attn_sa = jnp.einsum("bhdn,bhdp->bhnp", qn, k_proj) * p["temperature2"][None, :, None, None]
    attn_sa = jax.nn.softmax(attn_sa, axis=-1)
    x_sa = jnp.einsum("bhnp,bhdp->bhnd", attn_sa, v_proj)
    x_sa = x_sa.transpose(0, 2, 1, 3).reshape(B, N, C)      # heads folded back to channels

    epa = jnp.concatenate([x_sa @ p["w_op"].T + p["b_op"],
                           x_ca @ p["w_op2"].T + p["b_op2"]], axis=-1)
    attn_tok = x + p["gamma"] * epa

    vol = attn_tok.reshape(B, Hs, Ws, Ds, C)
    dn = ("NDHWC", "DHWIO", "NDHWC")

    def bn(v, prm):
        return (v - prm["mean"]) / jnp.sqrt(prm["var"] + BN_EPS) * prm["w"] + prm["b"]

    def lrelu(v):
        return jnp.where(v > 0, v, LRELU_SLOPE * v)

    h = lrelu(bn(jax.lax.conv_general_dilated(vol, p["w_c1"], (1, 1, 1), "SAME",
                                              dimension_numbers=dn), p["bn1"]))
    h = bn(jax.lax.conv_general_dilated(h, p["w_c2"], (1, 1, 1), "SAME",
                                        dimension_numbers=dn), p["bn2"])
    h = lrelu(h + vol)
    out8 = jnp.einsum("bxyzc,oc->bxyzo", h, p["w_c8"]) + p["b_c8"]
    y = vol + out8
    return y.transpose(0, 4, 1, 2, 3)


def reference_forward(inp, skip, params):
    B = inp.shape[0]
    up = jnp.einsum("bcijk,codef->boidjekf", inp, params["wt"])
    up = up.reshape(B, C_OUT, S_OUT, S_OUT, S_OUT)
    x = up + skip
    for bp in params["blocks"]:
        x = _reference_transformer_block(x, bp)
    return x


if __name__ == "__main__":
    key = jax.random.PRNGKey(0)
    k1, k2, kp = jax.random.split(key, 3)
    inp = jax.random.normal(k1, (BATCH, C_IN, S_IN, S_IN, S_IN), jnp.float32)
    skip = jax.random.normal(k2, (BATCH, C_OUT, S_OUT, S_OUT, S_OUT), jnp.float32)
    params = init_params(kp)

    out = unetr_up_block1_forward(inp, skip, params)
    out = jax.block_until_ready(out)

    ref = reference_forward(inp, skip, params)
    # tolerance loosened vs. the f32 reference: matmul operands run in bf16 on the MXU
    # (f32 accumulation) and softmax uses the approx EUP reciprocal, chained over 3 blocks.
    np.testing.assert_allclose(np.asarray(out), np.asarray(ref), atol=2e-2, rtol=2e-2)
    print("KERNEL_OK")
</pallas_src>

<mosaic_0001>
module attributes {stable_mosaic.version = 11 : i64} {
  func.func @deconv_skip_kernel(%arg0: i32, %arg1: memref<128x64xbf16, #tpu.memory_space<vmem>>, %arg2: memref<64x256xbf16, #tpu.memory_space<vmem>>, %arg3: memref<128x256xf32, #tpu.memory_space<vmem>>, %arg4: memref<128x256xf32, #tpu.memory_space<vmem>>) attributes {dimension_semantics = [#tpu.dimension_semantics<arbitrary>], iteration_bounds = array<i64: 1>, scalar_prefetch = 0 : i64, scratch_operands = 0 : i64, tpu.core_type = #tpu.core_type<tc>, window_params = [{pipeline_mode = #tpu.pipeline_mode<synchronous>, transform_indices = @transform_0, window_bounds = array<i64: 128, 64>}, {pipeline_mode = #tpu.pipeline_mode<synchronous>, transform_indices = @transform_1, window_bounds = array<i64: 64, 256>}, {pipeline_mode = #tpu.pipeline_mode<synchronous>, transform_indices = @transform_2, window_bounds = array<i64: 128, 256>}, {pipeline_mode = #tpu.pipeline_mode<synchronous>, transform_indices = @transform_3, window_bounds = array<i64: 128, 256>}]} {
    %c0 = arith.constant 0 : index
    %c0_0 = arith.constant 0 : index
    %0 = vector.load %arg1[%c0, %c0_0] : memref<128x64xbf16, #tpu.memory_space<vmem>>, vector<128x64xbf16>
    %c0_1 = arith.constant 0 : index
    %c0_2 = arith.constant 0 : index
    %1 = vector.load %arg2[%c0_1, %c0_2] : memref<64x256xbf16, #tpu.memory_space<vmem>>, vector<64x256xbf16>
    %cst = arith.constant dense<0.000000e+00> : vector<128x256xf32>
    %2 = tpu.matmul %0, %1, %cst {dimension_numbers = #tpu.dot_dimension_numbers<[1], [0], [0], [1], [0, 0, 1, 1], [], []>} : vector<128x64xbf16>, vector<64x256xbf16>, vector<128x256xf32> -> vector<128x256xf32>
    %c0_3 = arith.constant 0 : index
    %c0_4 = arith.constant 0 : index
    %3 = vector.load %arg3[%c0_3, %c0_4] : memref<128x256xf32, #tpu.memory_space<vmem>>, vector<128x256xf32>
    %4 = arith.addf %2, %3 : vector<128x256xf32>
    %c0_5 = arith.constant 0 : index
    %c0_6 = arith.constant 0 : index
    %5 = vector.load %arg4[%c0_5, %c0_6] : memref<128x256xf32, #tpu.memory_space<vmem>>, vector<128x256xf32>
    tpu.vector_store %arg4[%c0_5, %c0_6], %4 {strides = array<i32>} : memref<128x256xf32, #tpu.memory_space<vmem>>, vector<128x256xf32>,
    return
  }
  func.func @transform_0(%arg0: i32) -> (i32, i32) {
    %c0_i32 = arith.constant 0 : i32
    %c0_i32_0 = arith.constant 0 : i32
    %c0_i32_1 = arith.constant 0 : i32
    return %c0_i32, %c0_i32_0 : i32, i32
  }
  func.func @transform_1(%arg0: i32) -> (i32, i32) {
    %c0_i32 = arith.constant 0 : i32
    %c0_i32_0 = arith.constant 0 : i32
    %c0_i32_1 = arith.constant 0 : i32
    return %c0_i32, %c0_i32_0 : i32, i32
  }
  func.func @transform_2(%arg0: i32) -> (i32, i32) {
    %c0_i32 = arith.constant 0 : i32
    %c0_i32_0 = arith.constant 0 : i32
    %c0_i32_1 = arith.constant 0 : i32
    return %c0_i32, %c0_i32_0 : i32, i32
  }
  func.func @transform_3(%arg0: i32) -> (i32, i32) {
    %c0_i32 = arith.constant 0 : i32
    %c0_i32_0 = arith.constant 0 : i32
    %c0_i32_1 = arith.constant 0 : i32
    return %c0_i32, %c0_i32_0 : i32, i32
  }
}

</mosaic_0001>

<bundles_post_ra>
// kernel: run_upsample_skip.1
= control target key start
LH: loop header
LB: loop body
LE: loop exit
PB: predicated region body
PF: predicated region fallthrough
CT: control target
= control target key end

     0   :  { %vm151_vm0 = vcmask 523264   ;;  %s714_s1 = inlined_call_operand.vmem [shape: bf16[64,256], index: 1, kind: input, shape index: {}]   ;;  %s715_s0 = inlined_call_operand.vmem [shape: bf16[128,64], index: 0, kind: input, shape index: {}]   ;;  %s716_s2 = inlined_call_operand.vmem [shape: f32[128,256], index: 2, kind: input, shape index: {}]   ;;  %s717_s3 = inlined_call_operand.vmem [shape: f32[128,256], index: 3, kind: output, shape index: {}]  }
   0x1   :  { %v368_v0 = vld [vmem:[%s714_s1 + $0x30] sm:$0xf]  ;;  %v405_v1 = vld [vmem:[%s714_s1 + $0x34] sm:$0xf0]  ;;  %v404_v2 = vld [vmem:[%s714_s1 + $0x34] sm:$0xf] }
   0x2   :  { %v369_v3 = vor.u32 %v405_v1, %v368_v0  ;;  %v370_v4 = vld [vmem:[%s714_s1 + $0x38] sm:$0xf0]  ;;  %v360_v5 = vld [vmem:[%s714_s1 + $0x20] sm:$0xf]  ;;  %v403_v6 = vld [vmem:[%s714_s1 + $0x24] sm:$0xf0] }
   0x3   :  { %v373_v7 = vor.u32 %v404_v2, %v370_v4  ;;  %v402_v8 = vld [vmem:[%s714_s1 + $0x24] sm:$0xf]  ;;  %v362_v9 = vld [vmem:[%s714_s1 + $0x28] sm:$0xf0]  ;;  %v361_v10 = vor.u32 %v403_v6, %v360_v5  ;;  %v352_v12 = vld [vmem:[%s714_s1 + $0x10] sm:$0xf] }
   0x4   :  { %180 = vmatpush.bf16.msra.mxu0 %v369_v3  ;;  %406 = vmatpush.bf16.msra.mxu2 %v369_v3  ;;  %v365_v11 = vor.u32 %v402_v8, %v362_v9  ;;  %v401_v13 = vld [vmem:[%s714_s1 + $0x14] sm:$0xf0]  ;;  %v400_v14 = vld [vmem:[%s714_s1 + $0x14] sm:$0xf]  ;;  %v354_v15 = vld [vmem:[%s714_s1 + $0x18] sm:$0xf0] }
   0x5   :  { %229 = vmatpush.bf16.msra.mxu1 %v373_v7  ;;  %410 = vmatpush.bf16.msra.mxu3 %v373_v7  ;;  %v353_v16 = vor.u32 %v401_v13, %v352_v12  ;;  %v357_v17 = vor.u32 %v400_v14, %v354_v15  ;;  %v344_v18 = vld [vmem:[%s714_s1] sm:$0xf]  ;;  %v399_v19 = vld [vmem:[%s714_s1 + $0x4] sm:$0xf0]  ;;  %v398_v20 = vld [vmem:[%s714_s1 + $0x4] sm:$0xf] }
   0x6   :  { %v346_v21 = vld [vmem:[%s714_s1 + $0x8] sm:$0xf0]  ;;  %v345_v22 = vor.u32 %v399_v19, %v344_v18  ;;  %v390_v24 = vld [vmem:[%s715_s0] sm:$0xff]  ;;  %v392_v28 = vld [vmem:[%s715_s0 + $0x10] sm:$0xff] }
   0x7   :  { %v349_v23 = vor.u32 %v398_v20, %v346_v21  ;;  %v394_v25 = vld [vmem:[%s715_s0 + $0x20] sm:$0xff]  ;;  %v391_v26 = vld [vmem:[%s715_s0 + $0x8] sm:$0xff]  ;;  %v396_v29 = vld [vmem:[%s715_s0 + $0x30] sm:$0xff] }
   0x8   :  { %181 = vmatpush.bf16.msra.mxu0 %v361_v10  ;;  %407 = vmatpush.bf16.msra.mxu2 %v361_v10  ;;  %v395_v27 = vld [vmem:[%s715_s0 + $0x28] sm:$0xff]  ;;  %v393_v30 = vld [vmem:[%s715_s0 + $0x18] sm:$0xff]  ;;  %v39_v32 = vld [vmem:[%s716_s2] sm:$0xff] }
   0x9   :  { %230 = vmatpush.bf16.msra.mxu1 %v365_v11  ;;  %411 = vmatpush.bf16.msra.mxu3 %v365_v11  ;;  %v397_v31 = vld [vmem:[%s715_s0 + $0x38] sm:$0xff]  ;;  %v40_v33 = vld [vmem:[%s716_s2 + $0x8] sm:$0xff]  ;;  %v55_v38 = vld [vmem:[%s716_s2 + $0x80] sm:$0xff] }
   0xa   :  { %v56_v39 = vld [vmem:[%s716_s2 + $0x88] sm:$0xff]  ;;  %v41_v41 = vld [vmem:[%s716_s2 + $0x10] sm:$0xff]  ;;  %v42_v44 = vld [vmem:[%s716_s2 + $0x18] sm:$0xff] }
   0xb   :  { %v57_v50 = vld [vmem:[%s716_s2 + $0x90] sm:$0xff]  ;;  %v58_v51 = vld [vmem:[%s716_s2 + $0x98] sm:$0xff]  ;;  %v43_v53 = vld [vmem:[%s716_s2 + $0x20] sm:$0xff] }
   0xc   :  { %182 = vmatpush.bf16.msra.mxu0 %v353_v16  ;;  %408 = vmatpush.bf16.msra.mxu2 %v353_v16  ;;  %v44_v56 = vld [vmem:[%s716_s2 + $0x28] sm:$0xff]  ;;  %v59_v62 = vld [vmem:[%s716_s2 + $0xa0] sm:$0xff]  ;;  %v45_v1 = vld [vmem:[%s716_s2 + $0x30] sm:$0xff] }
   0xd   :  { %231 = vmatpush.bf16.msra.mxu1 %v357_v17  ;;  %412 = vmatpush.bf16.msra.mxu3 %v357_v17  ;;  %v60_v63 = vld [vmem:[%s716_s2 + $0xa8] sm:$0xff]  ;;  %v46_v4 = vld [vmem:[%s716_s2 + $0x38] sm:$0xff]  ;;  %v61_v10 = vld [vmem:[%s716_s2 + $0xb0] sm:$0xff] }
   0xe   :  { %v62_v11 = vld [vmem:[%s716_s2 + $0xb8] sm:$0xff]  ;;  %v47_v13 = vld [vmem:[%s716_s2 + $0x40] sm:$0xff]  ;;  %v48_v16 = vld [vmem:[%s716_s2 + $0x48] sm:$0xff] }
  0x10   :  { %183 = vmatpush.bf16.msra.mxu0 %v345_v22  ;;  %409 = vmatpush.bf16.msra.mxu2 %v345_v22  ;;  %v63_v22 = vld [vmem:[%s716_s2 + $0xc0] sm:$0xff] }
  0x11   :  { %232 = vmatpush.bf16.msra.mxu1 %v349_v23  ;;  %413 = vmatpush.bf16.msra.mxu3 %v349_v23  ;;  %v64_v23 = vld [vmem:[%s716_s2 + $0xc8] sm:$0xff] }
  0x13   :  { %374 = vmatmul.msk.bf16.vlgmr.msra.gmra.mxu0 %vm151_vm0, %v390_v24  ;;  %378 = vmatmul.msk.bf16.vlgmr.msra.gmra.mxu2 %vm151_vm0, %v394_v25 }
  0x14   :  { %382 = vmatmul.msk.bf16.vlgmr.msra.gmra.mxu1 %vm151_vm0, %v390_v24  ;;  %386 = vmatmul.msk.bf16.vlgmr.msra.gmra.mxu3 %vm151_vm0, %v394_v25  ;;  %v49_v25 = vld [vmem:[%s716_s2 + $0x50] sm:$0xff] }
  0x23   :  { %375 = vmatmul.msk.bf16.gmra.mxu0 %vm151_vm0, %v391_v26  ;;  %379 = vmatmul.msk.bf16.gmra.mxu2 %vm151_vm0, %v395_v27 }
  0x24   :  { %383 = vmatmul.msk.bf16.gmra.mxu1 %vm151_vm0, %v391_v26  ;;  %387 = vmatmul.msk.bf16.gmra.mxu3 %vm151_vm0, %v395_v27 }
  0x33   :  { %376 = vmatmul.msk.bf16.gmra.mxu0 %vm151_vm0, %v392_v28  ;;  %380 = vmatmul.msk.bf16.gmra.mxu2 %vm151_vm0, %v396_v29 }
  0x34   :  { %384 = vmatmul.msk.bf16.gmra.mxu1 %vm151_vm0, %v392_v28  ;;  %388 = vmatmul.msk.bf16.gmra.mxu3 %vm151_vm0, %v396_v29  ;;  %v50_v28 = vld [vmem:[%s716_s2 + $0x58] sm:$0xff] }
  0x43   :  { %377 = vmatmul.msk.bf16.gmra.mxu0 %vm151_vm0, %v393_v30  ;;  %381 = vmatmul.msk.bf16.gmra.mxu2 %vm151_vm0, %v397_v31 }
  0x44   :  { %385 = vmatmul.msk.bf16.gmra.mxu1 %vm151_vm0, %v393_v30  ;;  %389 = vmatmul.msk.bf16.gmra.mxu3 %vm151_vm0, %v397_v31 }
  0x90   :  { %v185_v34 = vpop.f32.mrf.mxu0 }
  0x91   :  { %v186_v35 = vadd.f32 %v185_v34, %v39_v32  ;;  %v234_v36 = vpop.f32.mrf.mxu1  ;;  %v65_v34 = vld [vmem:[%s716_s2 + $0xd0] sm:$0xff] }
  0x92   :  { %v235_v37 = vadd.f32 %v234_v36, %v40_v33 }
  0x93   :  { %274 = vst [vmem:[%s717_s3] sm:$0xff] %v186_v35  ;;  %v66_v35 = vld [vmem:[%s716_s2 + $0xd8] sm:$0xff] }
  0x94   :  { %275 = vst [vmem:[%s717_s3 + $0x8] sm:$0xff] %v235_v37  ;;  %v51_v37 = vld [vmem:[%s716_s2 + $0x60] sm:$0xff] }
  0x96   :  { %v205_v40 = vpop.f32.mrf.mxu2 }
  0x97   :  { %v206_v42 = vadd.f32 %v205_v40, %v55_v38  ;;  %v254_v43 = vpop.f32.mrf.mxu3  ;;  %v52_v40 = vld [vmem:[%s716_s2 + $0x68] sm:$0xff] }
  0x98   :  { %v255_v45 = vadd.f32 %v254_v43, %v56_v39  ;;  %v187_v46 = vpop.f32.mrf.mxu0 }
  0x99   :  { %290 = vst [vmem:[%s717_s3 + $0x80] sm:$0xff] %v206_v42  ;;  %v188_v47 = vadd.f32 %v187_v46, %v41_v41  ;;  %v236_v48 = vpop.f32.mrf.mxu1  ;;  %v67_v46 = vld [vmem:[%s716_s2 + $0xe0] sm:$0xff] }
  0x9a   :  { %291 = vst [vmem:[%s717_s3 + $0x88] sm:$0xff] %v255_v45  ;;  %v237_v49 = vadd.f32 %v236_v48, %v42_v44 }
  0x9b   :  { %276 = vst [vmem:[%s717_s3 + $0x10] sm:$0xff] %v188_v47  ;;  %v68_v47 = vld [vmem:[%s716_s2 + $0xe8] sm:$0xff] }
  0x9c   :  { %277 = vst [vmem:[%s717_s3 + $0x18] sm:$0xff] %v237_v49  ;;  %v53_v49 = vld [vmem:[%s716_s2 + $0x70] sm:$0xff] }
  0x9e   :  { %v207_v52 = vpop.f32.mrf.mxu2 }
  0x9f   :  { %v208_v54 = vadd.f32 %v207_v52, %v57_v50  ;;  %v256_v55 = vpop.f32.mrf.mxu3  ;;  %v54_v52 = vld [vmem:[%s716_s2 + $0x78] sm:$0xff] }
  0xa0   :  { %v257_v57 = vadd.f32 %v256_v55, %v58_v51  ;;  %v190_v58 = vpop.f32.mrf.mxu0 }
  0xa1   :  { %292 = vst [vmem:[%s717_s3 + $0x90] sm:$0xff] %v208_v54  ;;  %v191_v59 = vadd.f32 %v190_v58, %v43_v53  ;;  %v239_v60 = vpop.f32.mrf.mxu1  ;;  %v69_v58 = vld [vmem:[%s716_s2 + $0xf0] sm:$0xff] }
  0xa2   :  { %293 = vst [vmem:[%s717_s3 + $0x98] sm:$0xff] %v257_v57  ;;  %v240_v61 = vadd.f32 %v239_v60, %v44_v56 }
  0xa3   :  { %278 = vst [vmem:[%s717_s3 + $0x20] sm:$0xff] %v191_v59  ;;  %v70_v59 = vld [vmem:[%s716_s2 + $0xf8] sm:$0xff] }
  0xa4   :  { %279 = vst [vmem:[%s717_s3 + $0x28] sm:$0xff] %v240_v61 }
  0xa6   :  { %v210_v0 = vpop.f32.mrf.mxu2 }
  0xa7   :  { %v211_v2 = vadd.f32 %v210_v0, %v59_v62  ;;  %v259_v3 = vpop.f32.mrf.mxu3 }
  0xa8   :  { %v260_v5 = vadd.f32 %v259_v3, %v60_v63  ;;  %v192_v6 = vpop.f32.mrf.mxu0 }
  0xa9   :  { %294 = vst [vmem:[%s717_s3 + $0xa0] sm:$0xff] %v211_v2  ;;  %v193_v7 = vadd.f32 %v192_v6, %v45_v1  ;;  %v241_v8 = vpop.f32.mrf.mxu1 }
  0xaa   :  { %295 = vst [vmem:[%s717_s3 + $0xa8] sm:$0xff] %v260_v5  ;;  %v242_v9 = vadd.f32 %v241_v8, %v46_v4 }
  0xab   :  { %280 = vst [vmem:[%s717_s3 + $0x30] sm:$0xff] %v193_v7 }
  0xac   :  { %281 = vst [vmem:[%s717_s3 + $0x38] sm:$0xff] %v242_v9 }
  0xae   :  { %v212_v12 = vpop.f32.mrf.mxu2 }
  0xaf   :  { %v213_v14 = vadd.f32 %v212_v12, %v61_v10  ;;  %v261_v15 = vpop.f32.mrf.mxu3 }
  0xb0   :  { %v262_v17 = vadd.f32 %v261_v15, %v62_v11  ;;  %v195_v18 = vpop.f32.mrf.mxu0 }
  0xb1   :  { %296 = vst [vmem:[%s717_s3 + $0xb0] sm:$0xff] %v213_v14  ;;  %v196_v19 = vadd.f32 %v195_v18, %v47_v13  ;;  %v244_v20 = vpop.f32.mrf.mxu1 }
  0xb2   :  { %297 = vst [vmem:[%s717_s3 + $0xb8] sm:$0xff] %v262_v17  ;;  %v245_v21 = vadd.f32 %v244_v20, %v48_v16 }
  0xb3   :  { %282 = vst [vmem:[%s717_s3 + $0x40] sm:$0xff] %v196_v19 }
  0xb4   :  { %283 = vst [vmem:[%s717_s3 + $0x48] sm:$0xff] %v245_v21 }
  0xb6   :  { %v215_v24 = vpop.f32.mrf.mxu2 }
  0xb7   :  { %v216_v26 = vadd.f32 %v215_v24, %v63_v22  ;;  %v264_v27 = vpop.f32.mrf.mxu3 }
  0xb8   :  { %v265_v29 = vadd.f32 %v264_v27, %v64_v23  ;;  %v197_v30 = vpop.f32.mrf.mxu0 }
  0xb9   :  { %298 = vst [vmem:[%s717_s3 + $0xc0] sm:$0xff] %v216_v26  ;;  %v198_v31 = vadd.f32 %v197_v30, %v49_v25  ;;  %v246_v32 = vpop.f32.mrf.mxu1 }
  0xba   :  { %299 = vst [vmem:[%s717_s3 + $0xc8] sm:$0xff] %v265_v29  ;;  %v247_v33 = vadd.f32 %v246_v32, %v50_v28 }
  0xbb   :  { %284 = vst [vmem:[%s717_s3 + $0x50] sm:$0xff] %v198_v31 }
  0xbc   :  { %285 = vst [vmem:[%s717_s3 + $0x58] sm:$0xff] %v247_v33 }
  0xbe   :  { %v217_v36 = vpop.f32.mrf.mxu2 }
  0xbf   :  { %v218_v38 = vadd.f32 %v217_v36, %v65_v34  ;;  %v266_v39 = vpop.f32.mrf.mxu3 }
  0xc0   :  { %v267_v41 = vadd.f32 %v266_v39, %v66_v35  ;;  %v200_v42 = vpop.f32.mrf.mxu0 }
  0xc1   :  { %300 = vst [vmem:[%s717_s3 + $0xd0] sm:$0xff] %v218_v38  ;;  %v201_v43 = vadd.f32 %v200_v42, %v51_v37  ;;  %v249_v44 = vpop.f32.mrf.mxu1 }
  0xc2   :  { %301 = vst [vmem:[%s717_s3 + $0xd8] sm:$0xff] %v267_v41  ;;  %v250_v45 = vadd.f32 %v249_v44, %v52_v40 }
  0xc3   :  { %286 = vst [vmem:[%s717_s3 + $0x60] sm:$0xff] %v201_v43 }
  0xc4   :  { %287 = vst [vmem:[%s717_s3 + $0x68] sm:$0xff] %v250_v45 }
  0xc6   :  { %v220_v48 = vpop.f32.mrf.mxu2 }
  0xc7   :  { %v221_v50 = vadd.f32 %v220_v48, %v67_v46  ;;  %v269_v51 = vpop.f32.mrf.mxu3 }
  0xc8   :  { %v270_v53 = vadd.f32 %v269_v51, %v68_v47  ;;  %v202_v54 = vpop.f32.mrf.mxu0 }
  0xc9   :  { %302 = vst [vmem:[%s717_s3 + $0xe0] sm:$0xff] %v221_v50  ;;  %v203_v55 = vadd.f32 %v202_v54, %v53_v49  ;;  %v251_v56 = vpop.f32.mrf.mxu1 }
  0xca   :  { %303 = vst [vmem:[%s717_s3 + $0xe8] sm:$0xff] %v270_v53  ;;  %v252_v57 = vadd.f32 %v251_v56, %v54_v52 }
  0xcb   :  { %288 = vst [vmem:[%s717_s3 + $0x70] sm:$0xff] %v203_v55 }
  0xcc   :  { %289 = vst [vmem:[%s717_s3 + $0x78] sm:$0xff] %v252_v57 }
  0xce   :  { %v222_v60 = vpop.f32.mrf.mxu2 }
  0xcf   :  { %v223_v61 = vadd.f32 %v222_v60, %v69_v58  ;;  %v271_v62 = vpop.f32.mrf.mxu3 }
  0xd0   :  { %v272_v63 = vadd.f32 %v271_v62, %v70_v59 }
  0xd1   :  { %304 = vst [vmem:[%s717_s3 + $0xf0] sm:$0xff] %v223_v61 }
  0xd2   :  { %305 = vst [vmem:[%s717_s3 + $0xf8] sm:$0xff] %v272_v63 }

</bundles_post_ra>
